<compile_context>
chip_gen: v7x
topology: tpu7x:2x2x1
jax: 0.10.0
libtpu: 0.0.40
codegen_flags: <defaults>
</compile_context>

<pallas_src>
import functools

import jax
import jax.numpy as jnp
from jax.experimental import pallas as pl
from jax.experimental.pallas import tpu as pltpu


def graph_gnn_kernel(
    xT_ref, windT_ref, econst_ref, gcomb_ref, sT_ref,
    w_proj_ref, w1wT_ref, w2b_ref, w3b_ref,
    out_ref,
    pp_ref, acc_ref,
    *, e_h, e_out, n_pad):
  e_step = pl.program_id(1)
  last_e = pl.num_programs(1) - 1

  # Once per batch: project node features with the layer-1 src/tgt weights and
  # store them lane-concatenated as [ps | pt] so the edge gather is ONE matmul.
  @pl.when(e_step == 0)
  def _():
    proj = jnp.dot(w_proj_ref[...], xT_ref[0],
                   preferred_element_type=jnp.float32)            # [2*e_h, n_pad]
    pp_ref[:, :n_pad] = proj[:e_h].astype(jnp.bfloat16)           # W1s^T @ x^T
    pp_ref[:, n_pad:] = proj[e_h:].astype(jnp.bfloat16)           # W1t^T @ x^T
    acc_ref[...] = jnp.zeros_like(acc_ref)

  # --- edge path; everything is lane-dense [*, tE] ---
  # layer-1 linear part: gather + matmul fused -> src@W1s + tgt@W1t (transposed)
  h = jnp.dot(pp_ref[...], gcomb_ref[...],
              preferred_element_type=jnp.float32)                 # [e_h, tE]
  h += econst_ref[:e_h, :]                                        # attr_norm@W1a + b1

  # edge weight from de-normalized source wind (f32 VPU/EUP path)
  wind = windT_ref[0]                                             # [2, tE]
  speed = wind[0:1, :]
  direc = wind[1:2, :]
  dist = econst_ref[e_h:e_h + 1, :]
  cdir = econst_ref[e_h + 1:e_h + 2, :]
  theta = jnp.abs(cdir - direc)
  edge_w = jnp.maximum(
      speed * jnp.cos(theta) * pl.reciprocal(dist, approx=True), 0.0)  # [1, tE]
  h = jax.nn.sigmoid(h + w1wT_ref[...] * edge_w)                  # [e_h, tE]

  # edge_mlp layer 2 (bias folded into the last column of w2b)
  e = jax.nn.sigmoid(
      jnp.dot(w2b_ref[:, :e_h], h.astype(jnp.bfloat16),
              preferred_element_type=jnp.float32)
      + w2b_ref[:, e_h:e_h + 1].astype(jnp.float32))              # [e_out, tE]

  # scatter_add(+e, tgt) + scatter_add(-e, src) == e^T @ S^T, accumulated
  acc_ref[...] += jnp.dot(e.astype(jnp.bfloat16), sT_ref[...],
                          preferred_element_type=jnp.float32)     # [e_out, n_pad]

  # --- epilogue: node_mlp + lane-dense store [n_out, n_pad] ---
  @pl.when(e_step == last_e)
  def _():
    out_ref[0] = (jax.nn.sigmoid(
        jnp.dot(w3b_ref[:, :e_out], acc_ref[...].astype(jnp.bfloat16),
                preferred_element_type=jnp.float32)
        + w3b_ref[:, e_out:e_out + 1].astype(jnp.float32))
    ).astype(out_ref.dtype)


def _round_up(v, m):
  return (v + m - 1) // m * m


def graph_gnn_forward(x, edge_index, edge_attr, edge_attr_norm, params,
                      wind_max, wind_min):
  B, N, Din = x.shape
  E = edge_index.shape[1]
  w1, b1, w2, b2, w3, b3 = params
  e_h = w1.shape[1]
  e_out = w2.shape[1]
  n_out = w3.shape[1]

  edge_src = edge_index[0]
  edge_tgt = edge_index[1]

  f32, bf16 = jnp.float32, jnp.bfloat16

  # ---- tiling: N and E live on the lane axis; pad to multiples of 128 ----
  n_pad = _round_up(N, 128)
  t_e = _round_up(E, 128) if E <= 512 else 512
  e_pad = _round_up(E, t_e)
  n_e = e_pad // t_e
  pad_e = e_pad - E

  # ---- batch-invariant glue (plain JAX, built once) ----
  g_src = jnp.pad(jax.nn.one_hot(edge_src, n_pad, dtype=f32), ((0, pad_e), (0, 0)))
  g_tgt = jnp.pad(jax.nn.one_hot(edge_tgt, n_pad, dtype=f32), ((0, pad_e), (0, 0)))
  gcomb = jnp.concatenate([g_src.T, g_tgt.T], axis=0).astype(bf16)   # [2*n_pad, e_pad]
  s_t = (g_tgt - g_src).astype(bf16)                                 # [e_pad, n_pad] (S^T)

  # W1 row blocks for [src | tgt | attr_norm | edge_w]
  w1s, w1t = w1[:Din], w1[Din:2 * Din]
  w1a = w1[2 * Din:2 * Din + 2]
  w1w = w1[2 * Din + 2:2 * Din + 3]

  # precomputed batch-invariant layer-1 term, stacked with raw dist/direc rows
  edge_term = (edge_attr_norm @ w1a + b1.reshape(1, e_h)).T           # [e_h, E]
  dist = edge_attr[:, 0].reshape(1, E)
  cdir = edge_attr[:, 1].reshape(1, E)
  econst = jnp.concatenate([edge_term, dist, cdir], axis=0)           # [e_h+2, E]
  econst = jnp.pad(econst, ((0, 0), (0, pad_e)))
  if pad_e:
    econst = econst.at[e_h, E:].set(1.0)   # padded dist = 1 keeps reciprocal finite
  econst = econst.astype(f32)

  # packed weights (biases folded into an extra column)
  w_proj = jnp.concatenate([w1s.T, w1t.T], axis=0).astype(bf16)       # [2*e_h, Din]
  w1w_t = w1w.T.astype(f32)                                           # [e_h, 1]
  w2b = jnp.concatenate([w2.T, b2.reshape(1, e_out).T], axis=1).astype(bf16)
  w3b = jnp.concatenate([w3.T, b3.reshape(1, n_out).T], axis=1).astype(bf16)

  # per-batch inputs: transposed node features (bf16 MXU operand) and the
  # gathered, de-normalized source wind (f32 for the cos/reciprocal path).
  x_t = jnp.pad(jnp.swapaxes(x, 1, 2),
                ((0, 0), (0, 0), (0, n_pad - N))).astype(bf16)        # [B, Din, n_pad]
  src_wind = x[:, edge_src, Din - 2:] * (wind_max - wind_min) + wind_min   # [B, E, 2]
  wind_t = jnp.pad(jnp.swapaxes(src_wind, 1, 2),
                   ((0, 0), (0, 0), (0, pad_e))).astype(f32)          # [B, 2, e_pad]

  kernel = functools.partial(graph_gnn_kernel, e_h=e_h, e_out=e_out, n_pad=n_pad)

  in_specs = [
      pl.BlockSpec((1, Din, n_pad), lambda b, e: (b, 0, 0)),          # x^T (per batch)
      pl.BlockSpec((1, 2, t_e), lambda b, e: (b, 0, e)),              # wind^T
      pl.BlockSpec((e_h + 2, t_e), lambda b, e: (0, e)),              # econst
      pl.BlockSpec((2 * n_pad, t_e), lambda b, e: (0, e)),            # [Gsrc^T ; Gtgt^T]
      pl.BlockSpec((t_e, n_pad), lambda b, e: (e, 0)),                # S^T
      pl.BlockSpec((2 * e_h, Din), lambda b, e: (0, 0)),              # [W1s^T ; W1t^T]
      pl.BlockSpec((e_h, 1), lambda b, e: (0, 0)),                    # W1w^T
      pl.BlockSpec((e_out, e_h + 1), lambda b, e: (0, 0)),            # [W2^T | b2]
      pl.BlockSpec((n_out, e_out + 1), lambda b, e: (0, 0)),          # [W3^T | b3]
  ]
  out_spec = pl.BlockSpec((1, n_out, n_pad), lambda b, e: (b, 0, 0))

  # VMEM budget: double-buffered tiled blocks + resident weights + scratches.
  def _nbytes(shape, itemsize):
    n = 1
    for s in shape:
      n *= s
    return n * itemsize
  est = (2 * (_nbytes((Din, n_pad), 2) + _nbytes((2, t_e), 4)
              + _nbytes((e_h + 2, t_e), 4) + _nbytes((2 * n_pad, t_e), 2)
              + _nbytes((t_e, n_pad), 2) + _nbytes((n_out, n_pad), 4))
         + _nbytes((2 * e_h, Din), 2) + _nbytes((e_h, 1), 4)
         + _nbytes((e_out, e_h + 1), 2) + _nbytes((n_out, e_out + 1), 2)
         + _nbytes((e_h, 2 * n_pad), 2) + _nbytes((e_out, n_pad), 4))
  vmem_limit = int(min(max(2 * est, 32 * 1024 * 1024), 48 * 1024 * 1024))

  # TODO(synk): for v7x with B == 1, add a parallel grid axis over N tiles so
  # both TensorCores get work; with B >= 2 the batch axis already covers it.
  out_padded = pl.pallas_call(
      kernel,
      out_shape=jax.ShapeDtypeStruct((B, n_out, n_pad), jnp.float32),
      grid_spec=pltpu.PrefetchScalarGridSpec(
          num_scalar_prefetch=0,
          grid=(B, n_e),
          in_specs=in_specs,
          out_specs=out_spec,
          scratch_shapes=[
              pltpu.VMEM((e_h, 2 * n_pad), jnp.bfloat16),   # [ps | pt]
              pltpu.VMEM((e_out, n_pad), jnp.float32),      # node_agg^T accumulator
          ]),
      compiler_params=pltpu.CompilerParams(
          dimension_semantics=("parallel", "arbitrary"),
          vmem_limit_bytes=vmem_limit),
  )(x_t, wind_t, econst, gcomb, s_t, w_proj, w1w_t, w2b, w3b)

  # lane-dense kernel output [B, n_out, n_pad] -> [B, N, n_out]
  return jnp.swapaxes(out_padded, 1, 2)[:, :N, :]


def graph_gnn_reference(x, edge_index, edge_attr, edge_attr_norm, params,
                        wind_max, wind_min):
  """Pure-JAX (f32) mirror of the PyTorch forward(), for correctness checking."""
  w1, b1, w2, b2, w3, b3 = params
  B, N, Din = x.shape
  edge_src, edge_tgt = edge_index[0], edge_index[1]
  node_src = x[:, edge_src]
  node_tgt = x[:, edge_tgt]
  src_wind = node_src[:, :, -2:] * (wind_max[None, None, :] - wind_min[None, None, :]) \
      + wind_min[None, None, :]
  src_wind_speed = src_wind[:, :, 0]
  src_wind_direc = src_wind[:, :, 1]
  city_dist = jnp.broadcast_to(edge_attr[None, :, 0], src_wind_speed.shape)
  city_direc = jnp.broadcast_to(edge_attr[None, :, 1], src_wind_speed.shape)
  theta = jnp.abs(city_direc - src_wind_direc)
  edge_weight = jnp.maximum(src_wind_speed * jnp.cos(theta) / city_dist, 0.0)
  attr_norm_b = jnp.broadcast_to(edge_attr_norm[None], (B,) + edge_attr_norm.shape)
  feat = jnp.concatenate(
      [node_src, node_tgt, attr_norm_b, edge_weight[:, :, None]], axis=-1)
  h = jax.nn.sigmoid(feat @ w1 + b1)
  e = jax.nn.sigmoid(h @ w2 + b2)
  out_add = jnp.zeros((B, N, e.shape[-1]), jnp.float32).at[:, edge_tgt].add(e)
  out_sub = jnp.zeros((B, N, e.shape[-1]), jnp.float32).at[:, edge_src].add(-e)
  return jax.nn.sigmoid((out_add + out_sub) @ w3 + b3)


if __name__ == "__main__":
  key = jax.random.PRNGKey(0)
  B, N, E = 2, 16, 32           # batch, nodes, edges
  in_dim, out_dim = 8, 4        # node feature dims
  e_h, e_out = 32, 22           # fixed by the module

  k = jax.random.split(key, 10)
  x = jax.random.uniform(k[0], (B, N, in_dim), jnp.float32)
  edge_src = jax.random.randint(k[1], (E,), 0, N)
  edge_tgt = jax.random.randint(k[2], (E,), 0, N)
  edge_index = jnp.stack([edge_src, edge_tgt], axis=0)          # [2, E]
  dist = jax.random.uniform(k[3], (E,), jnp.float32, 0.5, 2.0)
  direc = jax.random.uniform(k[4], (E,), jnp.float32, 0.0, 6.28)
  edge_attr = jnp.stack([dist, direc], axis=1)                  # [E, 2]
  edge_attr_norm = (edge_attr - edge_attr.min(axis=0)) / (
      edge_attr.max(axis=0) - edge_attr.min(axis=0))

  wind_max = jnp.array([8.0, 6.28], jnp.float32)
  wind_min = jnp.array([0.5, 0.0], jnp.float32)

  fin = in_dim * 2 + 2 + 1
  w1 = 0.2 * jax.random.normal(k[5], (fin, e_h), jnp.float32)
  b1 = 0.1 * jax.random.normal(k[6], (1, e_h), jnp.float32)
  w2 = 0.2 * jax.random.normal(k[7], (e_h, e_out), jnp.float32)
  b2 = jnp.zeros((1, e_out), jnp.float32)
  w3 = 0.2 * jax.random.normal(k[8], (e_out, out_dim), jnp.float32)
  b3 = 0.1 * jax.random.normal(k[9], (1, out_dim), jnp.float32)
  params = (w1, b1, w2, b2, w3, b3)

  out = graph_gnn_forward(x, edge_index, edge_attr, edge_attr_norm, params,
                          wind_max, wind_min)
  out = jax.block_until_ready(out)

  ref = graph_gnn_reference(x, edge_index, edge_attr, edge_attr_norm, params,
                            wind_max, wind_min)
  assert out.shape == (B, N, out_dim)
  # bf16 MXU operands + approx reciprocal -> relaxed tolerance vs f32 reference.
  assert jnp.allclose(out, ref, atol=3e-2, rtol=3e-2), "mismatch vs reference"

  print("KERNEL_OK")
</pallas_src>

<mosaic_0001>
module attributes {stable_mosaic.version = 11 : i64} {
  func.func @graph_gnn_kernel(%arg0: i32, %arg1: i32, %arg2: memref<1x8x128xbf16, #tpu.memory_space<vmem>>, %arg3: memref<1x2x128xf32, #tpu.memory_space<vmem>>, %arg4: memref<34x128xf32, #tpu.memory_space<vmem>>, %arg5: memref<256x128xbf16, #tpu.memory_space<vmem>>, %arg6: memref<128x128xbf16, #tpu.memory_space<vmem>>, %arg7: memref<64x8xbf16, #tpu.memory_space<vmem>>, %arg8: memref<32x1xf32, #tpu.memory_space<vmem>>, %arg9: memref<22x33xbf16, #tpu.memory_space<vmem>>, %arg10: memref<4x23xbf16, #tpu.memory_space<vmem>>, %arg11: memref<1x4x128xf32, #tpu.memory_space<vmem>>, %arg12: memref<32x256xbf16, #tpu.memory_space<vmem>>, %arg13: memref<22x128xf32, #tpu.memory_space<vmem>>) attributes {dimension_semantics = [#tpu.dimension_semantics<parallel>, #tpu.dimension_semantics<arbitrary>], iteration_bounds = array<i64: 2, 1>, scalar_prefetch = 0 : i64, scratch_operands = 2 : i64, tpu.core_type = #tpu.core_type<tc>, window_params = [{transform_indices = @transform_0, window_bounds = array<i64: 1, 8, 128>}, {transform_indices = @transform_1, window_bounds = array<i64: 1, 2, 128>}, {transform_indices = @transform_2, window_bounds = array<i64: 34, 128>}, {transform_indices = @transform_3, window_bounds = array<i64: 256, 128>}, {transform_indices = @transform_4, window_bounds = array<i64: 128, 128>}, {pipeline_mode = #tpu.pipeline_mode<synchronous>, transform_indices = @transform_5, window_bounds = array<i64: 64, 8>}, {pipeline_mode = #tpu.pipeline_mode<synchronous>, transform_indices = @transform_6, window_bounds = array<i64: 32, 1>}, {pipeline_mode = #tpu.pipeline_mode<synchronous>, transform_indices = @transform_7, window_bounds = array<i64: 22, 33>}, {pipeline_mode = #tpu.pipeline_mode<synchronous>, transform_indices = @transform_8, window_bounds = array<i64: 4, 23>}, {transform_indices = @transform_9, window_bounds = array<i64: 1, 4, 128>}]} {
    %c0_i32 = arith.constant 0 : i32
    %0 = arith.cmpi eq, %arg1, %c0_i32 : i32
    %1 = arith.extui %0 : i1 to i32
    %c0_i32_0 = arith.constant 0 : i32
    %2 = arith.cmpi ne, %1, %c0_i32_0 : i32
    scf.if %2 {
      %c0_30 = arith.constant 0 : index
      %c0_31 = arith.constant 0 : index
      %53 = vector.load %arg7[%c0_30, %c0_31] : memref<64x8xbf16, #tpu.memory_space<vmem>>, vector<64x8xbf16>
      %c0_32 = arith.constant 0 : index
      %c0_33 = arith.constant 0 : index
      %c0_34 = arith.constant 0 : index
      %54 = vector.load %arg2[%c0_32, %c0_33, %c0_34] : memref<1x8x128xbf16, #tpu.memory_space<vmem>>, vector<1x8x128xbf16>
      %55 = vector.shape_cast %54 : vector<1x8x128xbf16> to vector<8x128xbf16>
      %cst_35 = arith.constant dense<0.000000e+00> : vector<64x128xf32>
      %56 = tpu.matmul %53, %55, %cst_35 {dimension_numbers = #tpu.dot_dimension_numbers<[1], [0], [0], [1], [0, 0, 1, 1], [], []>} : vector<64x8xbf16>, vector<8x128xbf16>, vector<64x128xf32> -> vector<64x128xf32>
      %57 = vector.extract_strided_slice %56 {offsets = [0, 0], sizes = [32, 128], strides = [1, 1]} : vector<64x128xf32> to vector<32x128xf32>
      %58 = arith.truncf %57 : vector<32x128xf32> to vector<32x128xbf16>
      %c0_36 = arith.constant 0 : index
      %c0_37 = arith.constant 0 : index
      %59 = vector.load %arg12[%c0_36, %c0_37] : memref<32x256xbf16, #tpu.memory_space<vmem>>, vector<32x128xbf16>
      tpu.vector_store %arg12[%c0_36, %c0_37], %58 {strides = array<i32>} : memref<32x256xbf16, #tpu.memory_space<vmem>>, vector<32x128xbf16>,
      %60 = vector.extract_strided_slice %56 {offsets = [32, 0], sizes = [32, 128], strides = [1, 1]} : vector<64x128xf32> to vector<32x128xf32>
      %61 = arith.truncf %60 : vector<32x128xf32> to vector<32x128xbf16>
      %c0_38 = arith.constant 0 : index
      %c128 = arith.constant 128 : index
      %62 = vector.load %arg12[%c0_38, %c128] : memref<32x256xbf16, #tpu.memory_space<vmem>>, vector<32x128xbf16>
      tpu.vector_store %arg12[%c0_38, %c128], %61 {strides = array<i32>} : memref<32x256xbf16, #tpu.memory_space<vmem>>, vector<32x128xbf16>,
      %cst_39 = arith.constant 0.000000e+00 : f32
      %63 = vector.broadcast %cst_39 : f32 to vector<22x128xf32>
      %c0_40 = arith.constant 0 : index
      %c0_41 = arith.constant 0 : index
      %64 = vector.load %arg13[%c0_40, %c0_41] : memref<22x128xf32, #tpu.memory_space<vmem>>, vector<22x128xf32>
      tpu.vector_store %arg13[%c0_40, %c0_41], %63 {strides = array<i32>} : memref<22x128xf32, #tpu.memory_space<vmem>>, vector<22x128xf32>,
    } else {
    }
    %c0 = arith.constant 0 : index
    %c0_1 = arith.constant 0 : index
    %3 = vector.load %arg12[%c0, %c0_1] : memref<32x256xbf16, #tpu.memory_space<vmem>>, vector<32x256xbf16>
    %c0_2 = arith.constant 0 : index
    %c0_3 = arith.constant 0 : index
    %4 = vector.load %arg5[%c0_2, %c0_3] : memref<256x128xbf16, #tpu.memory_space<vmem>>, vector<256x128xbf16>
    %cst = arith.constant dense<0.000000e+00> : vector<32x128xf32>
    %5 = tpu.matmul %3, %4, %cst {dimension_numbers = #tpu.dot_dimension_numbers<[1], [0], [0], [1], [0, 0, 1, 1], [], []>} : vector<32x256xbf16>, vector<256x128xbf16>, vector<32x128xf32> -> vector<32x128xf32>
    %c0_4 = arith.constant 0 : index
    %c0_5 = arith.constant 0 : index
    %6 = vector.load %arg4[%c0_4, %c0_5] : memref<34x128xf32, #tpu.memory_space<vmem>>, vector<32x128xf32>
    %7 = arith.addf %5, %6 : vector<32x128xf32>
    %c0_6 = arith.constant 0 : index
    %c0_7 = arith.constant 0 : index
    %c0_8 = arith.constant 0 : index
    %8 = vector.load %arg3[%c0_6, %c0_7, %c0_8] : memref<1x2x128xf32, #tpu.memory_space<vmem>>, vector<1x2x128xf32>
    %9 = vector.shape_cast %8 : vector<1x2x128xf32> to vector<2x128xf32>
    %10 = vector.extract_strided_slice %9 {offsets = [0, 0], sizes = [1, 128], strides = [1, 1]} : vector<2x128xf32> to vector<1x128xf32>
    %11 = vector.extract_strided_slice %9 {offsets = [1, 0], sizes = [1, 128], strides = [1, 1]} : vector<2x128xf32> to vector<1x128xf32>
    %c32 = arith.constant 32 : index
    %c0_9 = arith.constant 0 : index
    %12 = vector.load %arg4[%c32, %c0_9] : memref<34x128xf32, #tpu.memory_space<vmem>>, vector<1x128xf32>
    %c33 = arith.constant 33 : index
    %c0_10 = arith.constant 0 : index
    %13 = vector.load %arg4[%c33, %c0_10] : memref<34x128xf32, #tpu.memory_space<vmem>>, vector<1x128xf32>
    %14 = arith.subf %13, %11 : vector<1x128xf32>
    %15 = math.absf %14 : vector<1x128xf32>
    %16 = math.cos %15 : vector<1x128xf32>
    %17 = arith.mulf %10, %16 : vector<1x128xf32>
    %18 = tpu.reciprocal %12 {approx = true} : vector<1x128xf32> -> vector<1x128xf32>
    %19 = arith.mulf %17, %18 : vector<1x128xf32>
    %cst_11 = arith.constant 0.000000e+00 : f32
    %20 = vector.broadcast %cst_11 : f32 to vector<1x128xf32>
    %21 = arith.maximumf %19, %20 : vector<1x128xf32>
    %c0_12 = arith.constant 0 : index
    %c0_13 = arith.constant 0 : index
    %22 = vector.load %arg8[%c0_12, %c0_13] : memref<32x1xf32, #tpu.memory_space<vmem>>, vector<32x1xf32>
    %23 = vector.broadcast %22 : vector<32x1xf32> to vector<32x128xf32>
    %24 = vector.broadcast %21 : vector<1x128xf32> to vector<32x128xf32>
    %25 = arith.mulf %23, %24 : vector<32x128xf32>
    %26 = arith.addf %7, %25 : vector<32x128xf32>
    %27 = arith.negf %26 : vector<32x128xf32>
    %28 = math.exp %27 : vector<32x128xf32>
    %cst_14 = arith.constant 1.000000e+00 : f32
    %29 = vector.broadcast %cst_14 : f32 to vector<32x128xf32>
    %30 = arith.addf %29, %28 : vector<32x128xf32>
    %31 = arith.divf %29, %30 : vector<32x128xf32>
    %c0_15 = arith.constant 0 : index
    %c0_16 = arith.constant 0 : index
    %32 = vector.load %arg9[%c0_15, %c0_16] : memref<22x33xbf16, #tpu.memory_space<vmem>>, vector<22x32xbf16>
    %33 = arith.truncf %31 : vector<32x128xf32> to vector<32x128xbf16>
    %cst_17 = arith.constant dense<0.000000e+00> : vector<22x128xf32>
    %34 = tpu.matmul %32, %33, %cst_17 {dimension_numbers = #tpu.dot_dimension_numbers<[1], [0], [0], [1], [0, 0, 1, 1], [], []>} : vector<22x32xbf16>, vector<32x128xbf16>, vector<22x128xf32> -> vector<22x128xf32>
    %c0_18 = arith.constant 0 : index
    %c32_19 = arith.constant 32 : index
    %35 = vector.load %arg9[%c0_18, %c32_19] : memref<22x33xbf16, #tpu.memory_space<vmem>>, vector<22x1xbf16>
    %36 = arith.extf %35 : vector<22x1xbf16> to vector<22x1xf32>
    %37 = vector.broadcast %36 : vector<22x1xf32> to vector<22x128xf32>
    %38 = arith.addf %34, %37 : vector<22x128xf32>
    %39 = arith.negf %38 : vector<22x128xf32>
    %40 = math.exp %39 : vector<22x128xf32>
    %cst_20 = arith.constant 1.000000e+00 : f32
    %41 = vector.broadcast %cst_20 : f32 to vector<22x128xf32>
    %42 = arith.addf %41, %40 : vector<22x128xf32>
    %43 = arith.divf %41, %42 : vector<22x128xf32>
    %c0_21 = arith.constant 0 : index
    %c0_22 = arith.constant 0 : index
    %44 = vector.load %arg13[%c0_21, %c0_22] : memref<22x128xf32, #tpu.memory_space<vmem>>, vector<22x128xf32>
    %45 = arith.truncf %43 : vector<22x128xf32> to vector<22x128xbf16>
    %c0_23 = arith.constant 0 : index
    %c0_24 = arith.constant 0 : index
    %46 = vector.load %arg6[%c0_23, %c0_24] : memref<128x128xbf16, #tpu.memory_space<vmem>>, vector<128x128xbf16>
    %cst_25 = arith.constant dense<0.000000e+00> : vector<22x128xf32>
    %47 = tpu.matmul %45, %46, %cst_25 {dimension_numbers = #tpu.dot_dimension_numbers<[1], [0], [0], [1], [0, 0, 1, 1], [], []>} : vector<22x128xbf16>, vector<128x128xbf16>, vector<22x128xf32> -> vector<22x128xf32>
    %48 = arith.addf %44, %47 : vector<22x128xf32>
    %c0_26 = arith.constant 0 : index
    %c0_27 = arith.constant 0 : index
    %49 = vector.load %arg13[%c0_26, %c0_27] : memref<22x128xf32, #tpu.memory_space<vmem>>, vector<22x128xf32>
    tpu.vector_store %arg13[%c0_26, %c0_27], %48 {strides = array<i32>} : memref<22x128xf32, #tpu.memory_space<vmem>>, vector<22x128xf32>,
    %c0_i32_28 = arith.constant 0 : i32
    %50 = arith.cmpi eq, %arg1, %c0_i32_28 : i32
    %51 = arith.extui %50 : i1 to i32
    %c0_i32_29 = arith.constant 0 : i32
    %52 = arith.cmpi ne, %51, %c0_i32_29 : i32
    scf.if %52 {
      %c0_30 = arith.constant 0 : index
      %c0_31 = arith.constant 0 : index
      %53 = vector.load %arg10[%c0_30, %c0_31] : memref<4x23xbf16, #tpu.memory_space<vmem>>, vector<4x22xbf16>
      %c0_32 = arith.constant 0 : index
      %c0_33 = arith.constant 0 : index
      %54 = vector.load %arg13[%c0_32, %c0_33] : memref<22x128xf32, #tpu.memory_space<vmem>>, vector<22x128xf32>
      %55 = arith.truncf %54 : vector<22x128xf32> to vector<22x128xbf16>
      %cst_34 = arith.constant dense<0.000000e+00> : vector<4x128xf32>
      %56 = tpu.matmul %53, %55, %cst_34 {dimension_numbers = #tpu.dot_dimension_numbers<[1], [0], [0], [1], [0, 0, 1, 1], [], []>} : vector<4x22xbf16>, vector<22x128xbf16>, vector<4x128xf32> -> vector<4x128xf32>
      %c0_35 = arith.constant 0 : index
      %c22 = arith.constant 22 : index
      %57 = vector.load %arg10[%c0_35, %c22] : memref<4x23xbf16, #tpu.memory_space<vmem>>, vector<4x1xbf16>
      %58 = arith.extf %57 : vector<4x1xbf16> to vector<4x1xf32>
      %59 = vector.broadcast %58 : vector<4x1xf32> to vector<4x128xf32>
      %60 = arith.addf %56, %59 : vector<4x128xf32>
      %61 = arith.negf %60 : vector<4x128xf32>
      %62 = math.exp %61 : vector<4x128xf32>
      %cst_36 = arith.constant 1.000000e+00 : f32
      %63 = vector.broadcast %cst_36 : f32 to vector<4x128xf32>
      %64 = arith.addf %63, %62 : vector<4x128xf32>
      %65 = arith.divf %63, %64 : vector<4x128xf32>
      %c0_37 = arith.constant 0 : index
      %c0_38 = arith.constant 0 : index
      %c0_39 = arith.constant 0 : index
      %66 = vector.load %arg11[%c0_37, %c0_38, %c0_39] : memref<1x4x128xf32, #tpu.memory_space<vmem>>, vector<1x4x128xf32>
      %67 = vector.shape_cast %66 : vector<1x4x128xf32> to vector<4x128xf32>
      %68 = vector.shape_cast %65 : vector<4x128xf32> to vector<1x4x128xf32>
      tpu.vector_store %arg11[%c0_37, %c0_38, %c0_39], %68 {strides = array<i32>} : memref<1x4x128xf32, #tpu.memory_space<vmem>>, vector<1x4x128xf32>,
    } else {
    }
    return
  }
  func.func @transform_0(%arg0: i32, %arg1: i32) -> (i32, i32, i32) {
    %c0_i32 = arith.constant 0 : i32
    %c0_i32_0 = arith.constant 0 : i32
    %c0_i32_1 = arith.constant 0 : i32
    return %arg0, %c0_i32, %c0_i32_0 : i32, i32, i32
  }
  func.func @transform_1(%arg0: i32, %arg1: i32) -> (i32, i32, i32) {
    %c0_i32 = arith.constant 0 : i32
    %c0_i32_0 = arith.constant 0 : i32
    return %arg0, %c0_i32, %arg1 : i32, i32, i32
  }
  func.func @transform_2(%arg0: i32, %arg1: i32) -> (i32, i32) {
    %c0_i32 = arith.constant 0 : i32
    %c0_i32_0 = arith.constant 0 : i32
    return %c0_i32, %arg1 : i32, i32
  }
  func.func @transform_3(%arg0: i32, %arg1: i32) -> (i32, i32) {
    %c0_i32 = arith.constant 0 : i32
    %c0_i32_0 = arith.constant 0 : i32
    return %c0_i32, %arg1 : i32, i32
  }
  func.func @transform_4(%arg0: i32, %arg1: i32) -> (i32, i32) {
    %c0_i32 = arith.constant 0 : i32
    %c0_i32_0 = arith.constant 0 : i32
    return %arg1, %c0_i32 : i32, i32
  }
  func.func @transform_5(%arg0: i32, %arg1: i32) -> (i32, i32) {
    %c0_i32 = arith.constant 0 : i32
    %c0_i32_0 = arith.constant 0 : i32
    %c0_i32_1 = arith.constant 0 : i32
    return %c0_i32, %c0_i32_0 : i32, i32
  }
  func.func @transform_6(%arg0: i32, %arg1: i32) -> (i32, i32) {
    %c0_i32 = arith.constant 0 : i32
    %c0_i32_0 = arith.constant 0 : i32
    %c0_i32_1 = arith.constant 0 : i32
    return %c0_i32, %c0_i32_0 : i32, i32
  }
  func.func @transform_7(%arg0: i32, %arg1: i32) -> (i32, i32) {
    %c0_i32 = arith.constant 0 : i32
    %c0_i32_0 = arith.constant 0 : i32
    %c0_i32_1 = arith.constant 0 : i32
    return %c0_i32, %c0_i32_0 : i32, i32
  }
  func.func @transform_8(%arg0: i32, %arg1: i32) -> (i32, i32) {
    %c0_i32 = arith.constant 0 : i32
    %c0_i32_0 = arith.constant 0 : i32
    %c0_i32_1 = arith.constant 0 : i32
    return %c0_i32, %c0_i32_0 : i32, i32
  }
  func.func @transform_9(%arg0: i32, %arg1: i32) -> (i32, i32, i32) {
    %c0_i32 = arith.constant 0 : i32
    %c0_i32_0 = arith.constant 0 : i32
    %c0_i32_1 = arith.constant 0 : i32
    return %arg0, %c0_i32, %c0_i32_0 : i32, i32, i32
  }
}

</mosaic_0001>

<bundles_post_ra>
// kernel: tpu_custom_call.1
= control target key start
LH: loop header
LB: loop body
LE: loop exit
PB: predicated region body
PF: predicated region fallthrough
CT: control target
= control target key end

     0   :  { %s2334_s0 = inlined_call_operand.vmem [shape: bf16[2,8,128], index: 0, kind: input, shape index: {}]   ;;  %s2335_s1 = inlined_call_operand.hbm [shape: f32[2,2,128], index: 1, kind: input, shape index: {}]   ;;  %s2336_s2 = inlined_call_operand.hbm [shape: f32[34,128], index: 2, kind: input, shape index: {}]   ;;  %s2337_s3 = inlined_call_operand.hbm [shape: bf16[256,128], index: 3, kind: input, shape index: {}]   ;;  %s2338_s4 = inlined_call_operand.vmem [shape: bf16[128,128], index: 4, kind: input, shape index: {}]   ;;  %s2339_s5 = inlined_call_operand.vmem [shape: bf16[64,8], index: 5, kind: input, shape index: {}]   ;;  %s2340_s6 = inlined_call_operand.vmem [shape: f32[32,1], index: 6, kind: input, shape index: {}]   ;;  %s2341_s7 = inlined_call_operand.vmem [shape: bf16[22,33], index: 7, kind: input, shape index: {}]   ;;  %s2342_s8 = inlined_call_operand.vmem [shape: bf16[4,23], index: 8, kind: input, shape index: {}]   ;;  %s2343_s9 = inlined_call_operand.hbm [shape: f32[2,4,128], index: 9, kind: output, shape index: {}]  }
   0x1   :  { %2351 = sst [smem:[#allocation16_spill]] %s2342_s8 }
   0x2   :  { %2352 = sst [smem:[#allocation17_spill]] %s2343_s9 }
   0x3   :  { %14 = vsyncpa [#allocation5], 0 }
   0x4   :  { %16 = vsyncpa [#allocation5 + $0x1], 0 }
   0x5   :  { %17 = vsyncpa [#allocation8], 0 }
   0x6   :  { %18 = vsyncpa [#allocation6], 0 }
   0x7   :  { %20 = vsyncpa [#allocation6 + $0x1], 0  ;;  %s1970_s30 = smov 0   ;;  %s1972_s10 = smov 0  }
   0x8   :  { %s1974_s11 = smov 0   ;;  %s1976_s12 = smov 0  }
   0x9   :  { %s1978_s13 = smov 0   ;;  %s1980_s14 = smov 0  }
   0xa LB: > { %2353 = sst [smem:[#allocation14_spill]] %s1878_s30  ;;  %s1376_s15 = sadd.s32 4294967295, %s1898_s14   ;;  %s1898_s14 = sphi %s1980_s14, %s26_s14   ;;  %s1894_s13 = sphi %s1978_s13, %s2376_s13   ;;  %s1890_s12 = sphi %s1976_s12, %s2375_s12   ;;  %s1886_s11 = sphi %s1974_s11, %s2374_s11   ;;  %s1882_s10 = sphi %s1972_s10, %s2373_s10   ;;  %s1878_s30 = sphi %s1970_s30, %s2372_s30  }
   0xb   : > { %s1377_s16 = sadd.s32 4294967294, %s1898_s14   ;;  %p86_p0 = scmp.ne.s32.totalorder %s1882_s10, %s1878_s30 }
   0xc   : > { %p2004_p1 = scmp.eq.s32.totalorder %s1376_s15, 0  ;;  %p2008_p2 = scmp.eq.s32.totalorder %s1376_s15, 1 }
   0xd   : > { %p278_p3 = scmp.eq.s32.totalorder %s1377_s16, 1  ;;  %p1378_p5 = scmp.ge.s32.totalorder %s1898_s14, 1 }
   0xe   : > { %s2354_s17 = scalar_select %p2004_p1, 1, 0 }
   0xf   : > { %p2014_p4 = por %p2004_p1, %p86_p0  ;;  %p2019_p6 = por %p278_p3, %p86_p0 }
  0x10   : > { %p285_p7 = scmp.lt.s32.totalorder %s1898_s14, 3  ;;  %s1900_s22 = smov [#allocation7]  }
  0x11   : > { %s2356_s19 = scalar_select %p2014_p4, 1, 0 }
  0x12   : > { %s2357_s20 = scalar_select %p2019_p6, 1, 0 }
  0x13   : > { %p2024_p8 = pnand %p1378_p5, %p285_p7  ;;  %s299_s23 = sshll.u32 %s1900_s22, 4  ;;  %s2028_s23 = int_to_ptr.vmem [resolvable:$true] %s299_s23 }
  0x14   : > { %2358 = sst [smem:[#allocation15_spill]] %s2357_s20  ;;  %s1901_s25 = smov [#allocation9]  }
  0x15   : > { %p1557_p9 = pneg %p2024_p8  ;;  %s314_s26 = sshll.u32 %s1901_s25, 4  ;;  %s2039_s26 = int_to_ptr.vmem [resolvable:$true] %s314_s26 }
  0x16   : > { %s1726_s29 = scalar_lea.hbm %s2336_s2, 640 }
  0x17   : > { %p2035_p11 = pnand %p1557_p9, %p2004_p1  ;;  %p1727_p12 = scmp.ne.s32.totalorder %s2336_s2, %s1726_s29 }
  0x18   : > { %p1733_p5 = scmp.lt.u32.totalorder %s1726_s29, %s2336_s2 }
  0x19   : > { %p1728_p13 = pneg %p2035_p11 }
  0x1b   : > { %p1729_p0 = pnand %p1728_p13, %p1727_p12 }
  0x1d   : > { %p1730_p3 = pneg %p1729_p0 }
  0x1f   : > { %p1735_p7 = pnand %p1733_p5, %p1730_p3 }
  0x21   : > { %1738 = shalt.err (!%p1735_p7)
}
  0x22   : > { %s1739_s25 = scalar_lea.vmem %s2028_s23, 640  ;;  %p1747_p1 = scmp.lt.s32.totalorder %s2028_s23, %s2028_s23 }
  0x23   : > { %p1740_p9 = scmp.ne.s32.totalorder %s2028_s23, %s1739_s25  ;;  %p1748_p12 = scmp.lt.s32.totalorder %s1739_s25, %s1739_s25 }
  0x25   : > { %p1742_p10 = pnand %p1740_p9, %p1728_p13  ;;  %p1749_p0 = por %p1748_p12, %p1747_p1 }
  0x27   : > { %p1743_p6 = pneg %p1742_p10 }
  0x29   : > { %p1750_p4 = pnand %p1749_p0, %p1743_p6 }
  0x2b   : > { %1753 = shalt.err (!%p1750_p4)
}
  0x2c   : > { %s1902_s20 = smov 128   ;;  %s1903_s27 = smov 8  }
  0x2d   : > { %1560 = dma.hbm_to_vmem [thread:$0]  (!%p2035_p11), %s2336_s2, 640, %s2028_s23, [#allocation8], %s1902_s20, %s1902_s20, %s1903_s27  }
  0x2e   : > { %s1754_s22 = scalar_lea.hbm %s2337_s3, 2048 }
  0x2f   : > { %p1755_p1 = scmp.ne.s32.totalorder %s2337_s3, %s1754_s22  ;;  %p1761_p10 = scmp.lt.u32.totalorder %s1754_s22, %s2337_s3 }
  0x31   : > { %p1757_p4 = pnand %p1755_p1, %p1728_p13 }
  0x33   : > { %p1758_p6 = pneg %p1757_p4 }
  0x35   : > { %p1763_p3 = pnand %p1761_p10, %p1758_p6 }
  0x37   : > { %1766 = shalt.err (!%p1763_p3)
}
  0x38   : > { %s1767_s23 = scalar_lea.vmem %s2039_s26, 2048  ;;  %p1775_p12 = scmp.lt.s32.totalorder %s2039_s26, %s2039_s26 }
  0x39   : > { %p1768_p5 = scmp.ne.s32.totalorder %s2039_s26, %s1767_s23  ;;  %p1776_p0 = scmp.lt.s32.totalorder %s1767_s23, %s1767_s23 }
  0x3b   : > { %p1770_p7 = pnand %p1768_p5, %p1728_p13  ;;  %p1777_p1 = por %p1776_p0, %p1775_p12 }
  0x3d   : > { %p1771_p9 = pneg %p1770_p7 }
  0x3f   : > { %p1778_p4 = pnand %p1777_p1, %p1771_p9 }
  0x41   : > { %1781 = shalt.err (!%p1778_p4)
}
  0x42   : > { %s1904_s8 = smov 64   ;;  %s1905_s9 = smov 4  }
  0x43   : > { %1563 = dma.hbm_to_vmem [thread:$0]  (!%p2035_p11), %s2337_s3, 2048, %s2039_s26, [#allocation8], %s1904_s8, %s1904_s8, %s1905_s9  }
  0x44   : > { %s38_s27 = sadd.s32 1, %s1894_s13  ;;  %s73_s28 = sadd.s32 1, %s1886_s11 }
  0x45   : > { %p40_p13 = scmp.ge.s32.totalorder %s38_s27, 2  ;;  %p80_p6 = scmp.ne.s32.totalorder %s1886_s11, %s1882_s10 }
  0x46   : > { %p81_p10 = scmp.eq.s32.totalorder %s1898_s14, 0  ;;  %p1574_p3 = scmp.lt.s32.totalorder %s1898_s14, 2 }
  0x47   : > { %s2378_s27 = smov (%p40_p13, %s38_s27), 0  ;;  %p2103_p7 = por %p2008_p2, %p80_p6 }
  0x48   : > { %p82_p5 = por %p81_p10, %p80_p6  ;;  %s68_s24 = ssub.s32 %s1894_s13, %s2378_s27 }
  0x49   : > { %s2361_s29 = scalar_select %p2103_p7, 1, 0 }
  0x4a   : > { %s356_s15 = sand.u32 1, %s1886_s11   ;;  %p71_p9 = scmp.eq.s32.totalorder %s68_s24, 0 }
  0x4b   : > { %s1383_s26 = sshll.u32 %s356_s15, 1  ;;  %s1384_s16 = sshll.u32 %s1894_s13, 5 }
  0x4c   : > { %s2112_s22 = scalar_select %p71_p9, %s1886_s11, %s73_s28  }
  0x4d   : > { %s2117_s8 = scalar_lea.hbm %s2335_s1, %s1384_s16  ;;  %s360_s18 = scalar_lea.vmem [#allocation4], %s1383_s26 }
  0x4e   : > { %s368_s9 = sshll.u32 %s360_s18, 4  ;;  %p2121_p2 = pnand %p1574_p3, %p82_p5  ;;  %s2125_s9 = int_to_ptr.vmem [resolvable:$true] %s368_s9 }
  0x4f   : > { %s357_s20 = scalar_lea.sflag [#allocation5], %s356_s15  ;;  %s1782_s28 = scalar_lea.hbm %s2117_s8, 32 }
  0x50   : > { %p1783_p11 = scmp.ne.s32.totalorder %s2117_s8, %s1782_s28  ;;  %p1784_p12 = pneg %p2121_p2 }
  0x51   : > { %s1787_s16 = scalar_lea.hbm %s2335_s1, 64  ;;  %p1788_p4 = scmp.lt.u32.totalorder %s2117_s8, %s2335_s1 }
  0x52   : > { %p1785_p0 = pnand %p1784_p12, %p1783_p11  ;;  %p1789_p13 = scmp.lt.u32.totalorder %s1787_s16, %s1782_s28 }
  0x53   : > { %p1791_p10 = scmp.lt.u32.totalorder %s1782_s28, %s2117_s8 }
  0x54   : > { %p1786_p1 = pneg %p1785_p0  ;;  %p1790_p6 = por %p1789_p13, %p1788_p4 }
  0x56   : > { %p1792_p3 = por %p1791_p10, %p1790_p6 }
  0x58   : > { %p1793_p5 = pnand %p1792_p3, %p1786_p1 }
  0x5a   : > { %1796 = shalt.err (!%p1793_p5)
}
  0x5b   : > { %s1797_s15 = scalar_lea.vmem %s2125_s9, 32  ;;  %s1906_s18 = smov [#allocation4]  }
  0x5c   : > { %p1798_p9 = scmp.ne.s32.totalorder %s2125_s9, %s1797_s15  ;;  %s1802_s24 = sshll.u32 %s1906_s18, 4  ;;  %s1803_s24 = int_to_ptr.vmem [resolvable:$false] %s1802_s24 }
  0x5d   : > { %s1804_s26 = scalar_lea.vmem %s1803_s24, 64  ;;  %p1805_p7 = scmp.lt.s32.totalorder %s2125_s9, %s1803_s24 }
  0x5e   : > { %p1800_p11 = pnand %p1798_p9, %p1784_p12  ;;  %p1806_p4 = scmp.lt.s32.totalorder %s1804_s26, %s1797_s15 }
  0x60   : > { %p1801_p0 = pneg %p1800_p11  ;;  %p1807_p13 = por %p1806_p4, %p1805_p7 }
  0x62   : > { %p1808_p6 = pnand %p1807_p13, %p1801_p0 }
  0x64   : > { %1811 = shalt.err (!%p1808_p6)
}
  0x65   : > { %1567 = dma.hbm_to_vmem [thread:$0]  (!%p2121_p2), %s2117_s8, 32, %s2125_s9, %s357_s20  }
  0x66   : > { %377 = sbr.rel (%p2024_p8) target bundleno = 1339 (0x53b), region = 56  ;;  %s2155_s28 = sand.u32 (!%p2024_p8), 1, %s1882_s10  }
  0x67   : > { %s1386_s16 = sshll.u32 (!%p2024_p8), %s2155_s28, 1  ;;  %s380_s25 = scalar_lea.sflag (!%p2024_p8), [#allocation5], %s2155_s28 }
  0x68   : > { %s2159_s23 = scalar_lea.vmem (!%p2024_p8), [#allocation4], %s1386_s16  ;;  %p2363_p7 = scmp.ne.s32.totalorder (!%p2024_p8), %s2356_s19, 0 }
  0x6d   : > { %1865 = dma.done.wait (%p2363_p7), %s380_s25, 32  }
  0x6e   : > { %1867 = vsyncadd (%p2363_p7), %s380_s25, 4294967264  ;;  %p2364_p2 = scmp.ne.s32.totalorder %s2354_s17, 0 }
  0x70   : > { %1869 = dma.done.wait (%p2364_p2), [#allocation8], 2688  }
  0x71   : > { %1871 = vsyncadd (%p2364_p2), [#allocation8], 4294964608  ;;  %p435_p8 = scmp.lt.s32.totalorder %s1890_s12, 1  ;;  %vm492_vm0 = vcmask 1043456   ;;  %vm479_vm1 = vcmask 64512   ;;  %v1655_v2 = vld [vmem:[%s2339_s5] sm:$0xff]  }
  0x72   : > { %v1656_v3 = vld [vmem:[%s2339_s5 + $0x8] sm:$0xff]   ;;  %1496 = vmatprep.mubr.msk.bf16.mxu0 %vm479_vm1, %v1655_v2  ;;  %v1657_v4 = vld [vmem:[%s2339_s5 + $0x10] sm:$0xff]   ;;  %v1658_v7 = vld [vmem:[%s2339_s5 + $0x18] sm:$0xff]   ;;  %v1907_v24 = vmov 0   ;;  %v1908_v51 = vmov 2102212464  }
  0x73   : > { %s436_s21 = scalar_select %p435_p8, %s1890_s12, 1  ;;  %v1659_v5 = vld [vmem:[#allocation9 + $0x40] sm:$0xff]   ;;  %v1661_v8 = vld [vmem:[#allocation9 + $0x48] sm:$0xff]   ;;  %v1663_v10 = vld [vmem:[#allocation9 + $0x50] sm:$0xff]   ;;  %1644 = vset.pattern.permute.xlu0 %v1907_v24  ;;  %1645 = vset.pattern.permute.xlu1 %v1907_v24  ;;  %v1909_v53 = vmov 920167782  }
  0x74   : > { %v1660_v6 = vld [vmem:[#allocation9] sm:$0xff]   ;;  %1449 = vmatprep.subr.bf16.mxu1 %v1659_v5  ;;  %v1662_v9 = vld [vmem:[#allocation9 + $0x8] sm:$0xff]   ;;  %v1664_v11 = vld [vmem:[#allocation9 + $0x10] sm:$0xff]   ;;  %v1910_v57 = vmov 1326507024   ;;  %vm960_vm8 = vcmask 261120  }
  0x75   : > { %s1390_s8 = sshll.u32 %s436_s21, 2  ;;  %1450 = vmatpush3.bf16.msra.mxu1 %v1660_v6  ;;  %v1665_v12 = vld [vmem:[#allocation9 + $0x58] sm:$0xff]   ;;  %v1667_v14 = vld [vmem:[#allocation9 + $0x60] sm:$0xff]   ;;  %v1669_v16 = vld [vmem:[#allocation9 + $0x68] sm:$0xff]   ;;  %v1911_v59 = vmov 683565275  }
  0x76   : > { %s438_s20 = scalar_lea.vmem %s2334_s0, %s1390_s8  ;;  %1451 = vmatprep.subr.bf16.mxu1 %v1661_v8  ;;  %v1666_v13 = vld [vmem:[#allocation9 + $0x18] sm:$0xff]   ;;  %v1668_v15 = vld [vmem:[#allocation9 + $0x20] sm:$0xff]   ;;  %v1670_v17 = vld [vmem:[#allocation9 + $0x28] sm:$0xff]   ;;  %v1912_v61 = vmov 2475754826   ;;  %vm1916_vm15 = vmmov 0  }
  0x77   : > { %v458_v0 = vld [vmem:[%s438_s20] sm:$0xf]  ;;  %v1671_v18 = vld [vmem:[#allocation9 + $0x70] sm:$0xff]   ;;  %v870_v25 = vld [vmem:[%s2340_s6 + $0x8] sm:$0xff]  ;;  %s2365_s9 = sld [smem:[#allocation16_spill]]  ;;  %s1389_s30 = sshll.u32 %s2155_s28, 2 }
  0x78   : > { %1540 = vmatprep.subr.msk.bf16.mxu0 %vm492_vm0, %v458_v0  ;;  %v494_v1 = vsel %vm492_vm0, %v458_v0, 0  ;;  %v1672_v19 = vld [vmem:[#allocation9 + $0x30] sm:$0xff]   ;;  %v1673_v20 = vld [vmem:[#allocation9 + $0x78] sm:$0xff]   ;;  %v1913_v0 = vmov 2131351028   ;;  %vm1182_vm0 = vcmask 1042432  }
  0x79   : > { %1495 = vmatpush3.bf16.msra.mxu0 %v494_v1  ;;  %1452 = vmatpush3.bf16.msra.mxu1 %v1662_v9  ;;  %v1674_v21 = vld [vmem:[#allocation9 + $0x38] sm:$0xff]   ;;  %v871_v23 = vld [vmem:[%s2340_s6 + $0x10] sm:$0xff]  ;;  %v2203_v39 = vld [vmem:[%s2159_s23] sm:$0x3]  ;;  %s1441_s20 = sshll.u32 %s1890_s12, 6  ;;  %s434_s19 = scalar_lea.vmem [#allocation10], %s1389_s30 }
  0x7a   : > { %1453 = vmatprep.subr.bf16.mxu1 %v1663_v10  ;;  %v869_v22 = vld [vmem:[%s2340_s6] sm:$0xff]  ;;  %885 = vperm.xlu1 %1645, %v871_v23   ;;  %v872_v26 = vld [vmem:[%s2340_s6 + $0x18] sm:$0xff]  ;;  %v761_v40 = vrot.slane %v2203_v39, 1  ;;  %s1247_s15 = sshll.u32 %s434_s19, 4  ;;  %s2366_s18 = sld [smem:[#allocation17_spill]]  ;;  %s2287_s15 = int_to_ptr.vmem [resolvable:$true] %s1247_s15 }
  0x7b   : > { %875 = vperm.xlu0 %1644, %v869_v22   ;;  %v759_v41 = vld [vmem:[#allocation7 + $0x21] sm:$0x1]  ;;  %s1234_s26 = scalar_lea.sflag [#allocation6], %s2155_s28  ;;  %s1812_s16 = scalar_lea.vmem %s2287_s15, 64 }
  0x7c   : > { %1497 = vmatmul.mubr.msk.bf16.vlgmr.msra.gmra.mrb[0].mxu0 %vm479_vm1, %v1656_v3  ;;  %v763_v42 = vsub.f32 %v759_v41, %v761_v40  ;;  %v929_v41 = vld [vmem:[%s2341_s7] sm:$0xff]   ;;  %p1813_p12 = scmp.ne.s32.totalorder %s2287_s15, %s1812_s16  ;;  %p2367_p1 = scmp.ne.s32.totalorder %s2361_s29, 0 }
  0x7d   : > { %1500 = vmatprep.mubr.msk.bf16.mxu0 %vm479_vm1, %v1657_v4  ;;  %1454 = vmatpush3.bf16.msra.mxu1 %v1664_v11  ;;  %s1919_s12 = smov [#allocation10]  }
  0x7e   : > { %1455 = vmatprep.subr.bf16.mxu1 %v1665_v12  ;;  %890 = vperm.xlu1 %1645, %v872_v26   ;;  %v2206_v43 = vand.u32 2147483647, %v763_v42  ;;  %p1814_p10 = pnand %p1813_p12, %p2367_p1  ;;  %s1816_s25 = sshll.u32 %s1919_s12, 4  ;;  %s1817_s25 = int_to_ptr.vmem [resolvable:$false] %s1816_s25 }
  0x7f   : > { %880 = vperm.xlu0 %1644, %v870_v25   ;;  %s1818_s21 = scalar_lea.vmem %s1817_s25, 128  ;;  %p1819_p5 = scmp.lt.s32.totalorder %s2287_s15, %s1817_s25 }
  0x80   : > { %v767_v44 = vand.u32 2139095040, %v2206_v43  ;;  %v771_v5 = vand.u32 8388607, %v2206_v43  ;;  %vm766_vm10 = vcmp.le.f32.partialorder %v2206_v43, 0.7853982  ;;  %vm854_vm14 = vweird.f32 %v2206_v43  ;;  %s2285_s24 = scalar_lea.hbm %s2366_s18, %s1441_s20  ;;  %p1815_p3 = pneg %p1814_p10 }
  0x81   : > { %1456 = vmatpush3.bf16.msra.mxu1 %v1666_v13  ;;  %p1820_p9 = scmp.lt.s32.totalorder %s1818_s21, %s1812_s16 }
  0x82   : > { %1457 = vmatprep.subr.bf16.mxu1 %v1667_v14  ;;  %v768_v45 = vshrl.u32 %v767_v44, 23  ;;  %v772_v11 = vor.u32 8388608, %v771_v5  ;;  %v2238_v44 = vld [vmem:[%s2341_s7 + $0x8] sm:$0x7] }
  0x83   : > { %p1821_p11 = por %p1820_p9, %p1819_p5 }
  0x84   : > { %1501 = vmatmul.mubr.msk.bf16.gmra.mrb[4].mxu0 %vm479_vm1, %v1658_v7  ;;  %v1415_v46 = vadd.s32 4294967169, %v768_v45  ;;  %v934_v45 = vunpack.c.l.bf16 %v929_v41  ;;  %vm1178_vm1 = vcmask 179200  }
  0x85   : > { %1458 = vmatpush3.bf16.msra.mxu1 %v1668_v15  ;;  %1508 = vmatprep.mubr.msk.bf16.mxu0 %vm960_vm8, %v929_v41  ;;  %p1822_p0 = pnand %p1821_p11, %p1815_p3 }
  0x86   : > { %1459 = vmatprep.subr.bf16.mxu1 %v1669_v16  ;;  %v774_v47 = vadd.s32 1, %v1415_v46  ;;  %v935_v46 = vunpack.c.h.bf16 %v929_v41 }
  0x88   : > { %vm775_vm2 = vcmp.gt.s32.totalorder %v774_v47, 0 }
  0x89   : > { %1460 = vmatpush3.bf16.msra.mxu1 %v1670_v17  ;;  %v776_v48 = vsel %vm775_vm2, %v774_v47, 0  ;;  %v812_v17 = vshll.u32 %v772_v11, 8  ;;  %v936_v47 = vunpack.c.l.bf16 %v2238_v44  ;;  %v893_v11 = vlaneseq }
  0x8a   : > { %1461 = vmatprep.subr.bf16.mxu1 %v1671_v18  ;;  %v778_v49 = vand.u32 31, %v776_v48  ;;  %v777_v55 = vshrl.u32 %v776_v48, 5  ;;  %v1914_v48 = vmov 32  }
  0x8b   : > { %1646 = vset.pattern.permute.xlu0 %v1914_v48  ;;  %1652 = vset.pattern.permute.xlu1 %v1914_v48 }
  0x8c   : > { %v779_v50 = vsub.s32 32, %v778_v49  ;;  %v790_v52 = vshll.u32 %v1908_v51, %v778_v49  ;;  %v793_v56 = vshll.u32 %v1909_v53, %v778_v49  ;;  %v781_v60 = vshll.u32 %v1911_v59, %v778_v49  ;;  %949 = vperm.xlu1 %1652, %v936_v47  }
  0x8d   : > { %1462 = vmatpush3.bf16.msra.mxu1 %v1672_v19  ;;  %v784_v63 = vshll.u32 %v1912_v61, %v778_v49  ;;  %v787_v2 = vshll.u32 %v1913_v0, %v778_v49  ;;  %vm799_vm3 = vcmp.lt.s32.totalorder %v777_v55, 4  ;;  %vm796_vm4 = vcmp.lt.s32.totalorder %v777_v55, 1 }
  0x8e   : > { %1463 = vmatprep.subr.bf16.mxu1 %v1673_v20  ;;  %v791_v54 = vshrl.u32 %v1909_v53, %v779_v50  ;;  %v794_v58 = vshrl.u32 %v1910_v57, %v779_v50  ;;  %v782_v62 = vshrl.u32 %v1912_v61, %v779_v50  ;;  %v785_v1 = vshrl.u32 %v1913_v0, %v779_v50 }
  0x8f   : > { %v788_v3 = vshrl.u32 %v1908_v51, %v779_v50  ;;  %vm798_vm5 = vcmp.lt.s32.totalorder %v777_v55, 3  ;;  %vm797_vm6 = vcmp.lt.s32.totalorder %v777_v55, 2  ;;  %v780_v22 = vshrl.u32 %v1911_v59, %v779_v50 }
  0x90   : > { %v792_v4 = vor.u32 %v791_v54, %v790_v52  ;;  %v795_v6 = vor.u32 %v794_v58, %v793_v56  ;;  %v783_v7 = vor.u32 %v782_v62, %v781_v60  ;;  %v786_v8 = vor.u32 %v785_v1, %v784_v63 }
  0x91   : > { %1464 = vmatpush3.bf16.msra.mxu1 %v1674_v21  ;;  %v789_v9 = vor.u32 %v788_v3, %v787_v2  ;;  %v1647_v49 = vpack.i.bf16 %v935_v46, %v934_v45  ;;  %v611_v45 = vld [vmem:[#allocation7 + $0x18] sm:$0xff] }
  0x92   : > { %v805_v10 = vsel %vm799_vm3, %v792_v4, 920167782  ;;  %v809_v12 = vsel %vm799_vm3, %v795_v6, 1326507024  ;;  %v804_v13 = vsel %vm796_vm4, %v783_v7, %v786_v8  ;;  %v800_v26 = vsel %vm796_vm4, %v780_v22, %v783_v7  ;;  %v758_v6 = vld [vmem:[#allocation7 + $0x20] sm:$0x1] }
  0x93   : > { %v806_v14 = vsel %vm798_vm5, %v789_v9, %v805_v10  ;;  %v808_v15 = vsel %vm796_vm4, %v786_v8, %v789_v9  ;;  %v810_v16 = vsel %vm798_vm5, %v792_v4, %v809_v12  ;;  %v801_v25 = vsel %vm799_vm3, %v789_v9, 2102212464  ;;  %1648 = vperm.xlu0 %1646, %v1647_v49  }
  0x94   : > { %v807_v18 = vsel %vm797_vm6, %v804_v13, %v806_v14  ;;  %v811_v19 = vsel %vm797_vm6, %v808_v15, %v810_v16  ;;  %v2246_v14 = vshrl.u32 %v893_v11, 7  ;;  %v1682_v11 = vld [vmem:[%s2338_s4 + $0x28] sm:$0xff]  }
  0x95   : > { %v2218_v20 = vmul.u32.u64.low %v812_v17, %v807_v18  ;;  %v2219_v21 = vmul.u32.u64.high %v812_v17, %v807_v18, %v2218_v20  ;;  %v2221_v23 = vmul.u32.u64.low %v812_v17, %v811_v19  ;;  %v2222_v24 = vmul.u32.u64.high %v812_v17, %v811_v19, %v2221_v23 }
  0x96   : > { %v895_v16 = vsub.s32 0, %v2246_v14 }
  0x97   : > { %vm821_vm7 = vc.u32 %v2222_v24, %v2218_v20  ;;  %v820_v52 = vadd.s32 %v2218_v20, %v2222_v24 }
  0xfa   : > { %v876_v18 = vpop.permute.xlu0 %875 }
  0xfe   : > { %v881_v23 = vpop.permute.xlu0 %880 }
 0x14f   : > { %v1498_v27 = vpop.f32.mrb[0].mxu0 }
 0x150   : > { %v530_v28 = vpop.f32.mrb[1].mxu0 }
 0x151   : > { %v1499_v29 = vpop.f32.mrb[2].mxu0 }
 0x152   : > { %v562_v30 = vpack.c.bf16 %v1499_v29, %v1498_v27  ;;  %v533_v31 = vpop.f32.mrb[3].mxu0  ;;  %v802_v27 = vsel %vm798_vm5, %v786_v8, %v801_v25  ;;  %v822_v29 = vadd.s32 1, %v2219_v21 }
 0x153   : > { %v561_v32 = vpack.c.bf16 %v533_v31, %v530_v28  ;;  %v803_v28 = vsel %vm797_vm6, %v800_v26, %v802_v27  ;;  %v609_v26 = vld [vmem:[#allocation7 + $0x8] sm:$0xff] }
 0x154   : > { %v823_v31 = vsel %vm821_vm7, %v822_v29, %v2219_v21  ;;  %v608_v21 = vld [vmem:[#allocation7] sm:$0xff] }
 0x157   : > { %v1502_v33 = vpop.f32.mrb[4].mxu0 }
 0x158   : > { %v546_v34 = vpop.f32.mrb[5].mxu0 }
 0x159   : > { %v1503_v35 = vpop.f32.mrb[6].mxu0 }
 0x15a   : > { %v566_v36 = vpack.c.bf16 %v1503_v35, %v1502_v33  ;;  %v549_v37 = vpop.f32.mrb[7].mxu0 }
 0x15b   : > { %v565_v38 = vpack.c.bf16 %v549_v37, %v546_v34 }
 0x15d   : > { %740 = vmatprep.mubr.bf16.mxu1 %v565_v38 }
 0x15e   : > { %741 = vmatmul.mubr.bf16.vlgmr.msra.gmra.mrb[0].mxu1 %v561_v32 }
 0x15f   : > { %748 = vmatprep.mubr.bf16.mxu1 %v566_v36 }
 0x166   : > { %749 = vmatmul.mubr.bf16.gmra.mrb[4].mxu1 %v562_v30  ;;  %v819_v30 = vmul.u32 %v812_v17, %v803_v28 }
 0x168   : > { %v824_v32 = vadd.s32 %v823_v31, %v819_v30  ;;  %v886_v30 = vpop.permute.xlu1 %885 }
 0x16a   : > { %v825_v33 = vadd.s32 536870912, %v824_v32 }
 0x16c   : > { %v826_v34 = vshrl.u32 %v825_v33, 30 }
 0x16e   : > { %v827_v35 = vshll.u32 %v826_v34, 30  ;;  %v851_v0 = vsel %vm766_vm10, 0, %v826_v34 }
 0x16f   : > { %v855_v3 = vand.u32 3, %v851_v0 }
 0x170   : > { %v828_v36 = vsub.s32 %v824_v32, %v827_v35 }
 0x171   : > { %vm857_vm11 = vcmp.eq.s32.totalorder %v855_v3, 0  ;;  %vm860_vm12 = vcmp.eq.s32.totalorder %v855_v3, 2  ;;  %vm856_vm13 = vcmp.lt.s32.totalorder %v855_v3, 2 }
 0x172   : > { %v830_v37 = vsub.s32 0, %v828_v36 }
 0x174   : > { %v1416_v38 = vmin.u32 %v830_v37, %v828_v36 }
 0x176   : > { %v832_v40 = vclz %v1416_v38 }
 0x178   : > { %v1417_v42 = vadd.s32 4294967294, %v832_v40 }
 0x17a   : > { %vm1418_vm9 = vcmp.lt.s32.totalorder %v1417_v42, 0 }
 0x17b   : > { %v835_v50 = vsel %vm1418_vm9, 0, %v1417_v42  ;;  %v891_v42 = vpop.permute.xlu1 %890 }
 0x17c   : > { %v840_v51 = vsub.s32 4294967266, %v835_v50  ;;  %v836_v53 = vsub.s32 32, %v835_v50  ;;  %v837_v55 = vshll.u32 %v828_v36, %v835_v50  ;;  %v610_v36 = vld [vmem:[#allocation7 + $0x10] sm:$0xff] }
 0x17e   : > { %v841_v54 = vadd.s32 127, %v840_v51  ;;  %v838_v56 = vshrl.u32 %v820_v52, %v836_v53 }
 0x180   : > { %v842_v57 = vshll.u32 %v841_v54, 23  ;;  %v839_v58 = vor.u32 %v838_v56, %v837_v55 }
 0x182   : > { %v843_v59 = vor.u32 4788187, %v842_v57  ;;  %v846_v61 = vcvt.s32.f32 %v839_v58 }
 0x184   : > { %v844_v60 = vand.u32 2147483647, %v843_v59 }
 0x186   : > { %v847_v62 = vmul.f32 %v846_v61, %v844_v60 }
 0x188   : > { %v850_v63 = vsel %vm766_vm10, %v2206_v43, %v847_v62 }
 0x189   : > { %1686 = vcosq.f32 %v850_v63 }
 0x18a   : > { %1688 = vsinq.f32 %v850_v63 }
 0x18b   : > { %1690 = vrcp.f32 %v758_v6  ;;  %v1424_v6 = vcombine.low %v2238_v44, %v2238_v44  ;;  %v1680_v44 = vld [vmem:[%s2338_s4 + $0x18] sm:$0xff]  }
 0x193   : > { %v1687_v1 = vpop.eup %1686 }
 0x194   : > { %v1689_v2 = vpop.eup %1688  ;;  %v861_v5 = vxor.u32 2147483648, %v1687_v1 }
 0x195   : > { %v858_v4 = vxor.u32 2147483648, %v1689_v2  ;;  %v1691_v13 = vpop.eup %1690 }
 0x196   : > { %v862_v8 = vsel %vm860_vm12, %v861_v5, %v1689_v2 }
 0x197   : > { %v859_v7 = vsel %vm857_vm11, %v1687_v1, %v858_v4 }
 0x198   : > { %v863_v9 = vsel %vm856_vm13, %v859_v7, %v862_v8  ;;  %v1677_v7 = vld [vmem:[%s2338_s4] sm:$0xff]   ;;  %v1678_v8 = vld [vmem:[%s2338_s4 + $0x8] sm:$0xff]  }
 0x199   : > { %v864_v10 = vsel %vm854_vm14, nan, %v863_v9  ;;  %v1679_v9 = vld [vmem:[%s2338_s4 + $0x10] sm:$0xff]  }
 0x19a   : > { %v865_v12 = vmul.f32 %v864_v10, %v2203_v39  ;;  %v1681_v10 = vld [vmem:[%s2338_s4 + $0x20] sm:$0xff]  }
 0x19c   : > { %v867_v15 = vmul.f32 %v1691_v13, %v865_v12  ;;  %v1683_v12 = vld [vmem:[%s2338_s4 + $0x30] sm:$0xff]   ;;  %v1684_v13 = vld [vmem:[%s2338_s4 + $0x38] sm:$0xff]  }
 0x19e   : > { %v868_v17 = vmax.f32 %v867_v15, 0.0  ;;  %v1915_v15 = vmov 0.0  }
 0x19f   : > { %571 = vst [vmem:[#allocation3 + $0x10] sm:$0x3f] %v1915_v15  ;;  %1532 = vmatprep.subr.bf16.mxu1 %v1915_v15  ;;  %1536 = vmatprep.mubr.msk.bf16.mxu1 %vm1916_vm15, %v1915_v15 }
 0x1a0   : > { %v896_v19 = vrot.slane %v868_v17, %v895_v16  ;;  %v1649_v16 = vpop.permute.xlu0 %1648  ;;  %v950_v17 = vpop.permute.xlu1 %949 }
 0x1a2   : > { %v897_v24 = vmul.f32 %v896_v19, %v876_v18  ;;  %v898_v29 = vmul.f32 %v896_v19, %v881_v23  ;;  %v899_v47 = vmul.f32 %v896_v19, %v886_v30  ;;  %v900_v50 = vmul.f32 %v896_v19, %v891_v42 }
 0x231   : > { %v1465_v20 = vpop.f32.mrb[0].mxu1 }
 0x232   : > { %v1466_v22 = vpop.f32.mrb[1].mxu1 }
 0x233   : > { %v1467_v43 = vadd.f32 %v1466_v22, %v1465_v20  ;;  %v1468_v25 = vpop.f32.mrb[2].mxu1 }
 0x234   : > { %v1469_v27 = vpop.f32.mrb[3].mxu1 }
 0x235   : > { %v743_v28 = vadd.f32 %v1467_v43, %v608_v21  ;;  %v1470_v39 = vadd.f32 %v1469_v27, %v1468_v25 }
 0x237   : > { %v901_v31 = vadd.f32 %v897_v24, %v743_v28  ;;  %v746_v32 = vadd.f32 %v1470_v39, %v609_v26 }
 0x239   : > { %v1419_v33 = vmul.f32 -1.442695, %v901_v31  ;;  %v902_v34 = vadd.f32 %v898_v29, %v746_v32  ;;  %v1471_v35 = vpop.f32.mrb[4].mxu1 }
 0x23a   : > { %v1472_v37 = vpop.f32.mrb[5].mxu1 }
 0x23b   : > { %1692 = vpow2.f32 %v1419_v33  ;;  %v1420_v38 = vmul.f32 -1.442695, %v902_v34  ;;  %v1473_v40 = vadd.f32 %v1472_v37, %v1471_v35  ;;  %v1474_v41 = vpop.f32.mrb[6].mxu1  ;;  %v1159_v37 = vld [vmem:[%s2365_s9] sm:$0x3] }
 0x23c   : > { %v1475_v46 = vpop.f32.mrb[7].mxu1 }
 0x23d   : > { %1694 = vpow2.f32 %v1420_v38  ;;  %v751_v48 = vadd.f32 %v1473_v40, %v610_v36  ;;  %v1476_v49 = vadd.f32 %v1475_v46, %v1474_v41  ;;  %v1165_v38 = vunpack.c.l.bf16 %v1159_v37  ;;  %v1035_v41 = vld [vmem:[#allocation3 + $0x10] sm:$0x3f] }
 0x23e   : > { %v1917_v40 = vmov 22  }
 0x23f   : > { %v903_v51 = vadd.f32 %v899_v47, %v751_v48  ;;  %v754_v52 = vadd.f32 %v1476_v49, %v611_v45  ;;  %1653 = vset.pattern.permute.xlu1 %v1917_v40  ;;  %1654 = vset.pattern.permute.xlu0 %v1917_v40 }
 0x240   : > { %1168 = vperm.xlu1 %1653, %v1165_v38  }
 0x241   : > { %v1421_v53 = vmul.f32 -1.442695, %v903_v51  ;;  %v904_v54 = vadd.f32 %v900_v50, %v754_v52 }
 0x243   : > { %1696 = vpow2.f32 %v1421_v53  ;;  %v1422_v55 = vmul.f32 -1.442695, %v904_v54  ;;  %v1918_v53 = vmov 839922192  }
 0x244   : > { %v1172_v54 = vunpack.c.l.s4 %v1918_v53 }
 0x245   : > { %v1693_v56 = vpop.eup %1692  ;;  %1698 = vpow2.f32 %v1422_v55 }
 0x246   : > { %v917_v57 = vadd.f32 1.0, %v1693_v56  ;;  %v1173_v55 = vunpack.c.0.s8 %v1172_v54 }
 0x247   : > { %v1695_v58 = vpop.eup %1694 }
 0x248   : > { %v918_v59 = vadd.f32 1.0, %v1695_v58  ;;  %1700 = vrcp.f32 %v917_v57  ;;  %v1176_v56 = vsub.s32 %v1173_v55, %v2246_v14 }
 0x24a   : > { %1702 = vrcp.f32 %v918_v59 }
 0x24d   : > { %v1697_v60 = vpop.eup %1696 }
 0x24e   : > { %v919_v61 = vadd.f32 1.0, %v1697_v60 }
 0x24f   : > { %v1699_v62 = vpop.eup %1698 }
 0x250   : > { %v920_v63 = vadd.f32 1.0, %v1699_v62  ;;  %1704 = vrcp.f32 %v919_v61 }
 0x252   : > { %1706 = vrcp.f32 %v920_v63  ;;  %v1701_v0 = vpop.eup %1700 }
 0x254   : > { %v1703_v1 = vpop.eup %1702 }
 0x255   : > { %v932_v2 = vpack.c.bf16 %v1703_v1, %v1701_v0 }
 0x257   : > { %1504 = vmatprep.subr.bf16.mxu0 %v932_v2 }
 0x258   : > { %1505 = vmatpush3.bf16.msra.mxu0 %v932_v2 }
 0x25a   : > { %v1705_v3 = vpop.eup %1704 }
 0x25c   : > { %v1707_v4 = vpop.eup %1706 }
 0x25d   : > { %v933_v5 = vpack.c.bf16 %v1707_v4, %v1705_v3 }
 0x25f   : > { %1506 = vmatprep.subr.bf16.mxu0 %v933_v5 }
 0x260   : > { %1507 = vmatpush3.bf16.msra.mxu0 %v933_v5 }
 0x261   : > { %1512 = vmatprep.subr.bf16.mxu0 %v1677_v7 }
 0x263   : > { %1509 = vmatmul.mubr.msk.bf16.vlgmr.msra.gmra.mrb[8].mxu0 %vm960_vm8, %v1424_v6 }
 0x264   : > { %1513 = vmatpush3.bf16.msra.mxu0 %v1677_v7 }
 0x265   : > { %1514 = vmatprep.subr.bf16.mxu0 %v1678_v8 }
 0x268   : > { %1515 = vmatpush3.bf16.msra.mxu0 %v1678_v8 }
 0x269   : > { %1516 = vmatprep.subr.bf16.mxu0 %v1679_v9 }
 0x26c   : > { %1517 = vmatpush3.bf16.msra.mxu0 %v1679_v9 }
 0x26d   : > { %1518 = vmatprep.subr.bf16.mxu0 %v1680_v44 }
 0x270   : > { %1519 = vmatpush3.bf16.msra.mxu0 %v1680_v44 }
 0x271   : > { %1520 = vmatprep.subr.bf16.mxu0 %v1681_v10 }
 0x274   : > { %1521 = vmatpush3.bf16.msra.mxu0 %v1681_v10 }
 0x275   : > { %1522 = vmatprep.subr.bf16.mxu0 %v1682_v11 }
 0x278   : > { %1523 = vmatpush3.bf16.msra.mxu0 %v1682_v11 }
 0x279   : > { %1524 = vmatprep.subr.bf16.mxu0 %v1683_v12 }
 0x27c   : > { %1525 = vmatpush3.bf16.msra.mxu0 %v1683_v12 }
 0x27d   : > { %1526 = vmatprep.subr.bf16.mxu0 %v1684_v13 }
 0x280   : > { %1527 = vmatpush3.bf16.msra.mxu0 %v1684_v13 }
 0x2bf   : > { %v1169_v57 = vpop.permute.xlu1 %1168 }
 0x2c0   : > { %v1177_v58 = vrot.slane %v1169_v57, %v1176_v56 }
 0x336   : > { %v1510_v18 = vpop.f32.mrb[8].mxu0 }
 0x337   : > { %v1010_v19 = vadd.f32 %v1510_v18, %v950_v17  ;;  %v1001_v20 = vpop.f32.mrb[9].mxu0 }
 0x338   : > { %v1724_v21 = vadd.low.f32.bf16 %v1001_v20, %v1649_v16  ;;  %v1511_v22 = vpop.f32.mrb[10].mxu0 }
 0x339   : > { %v1429_v23 = vmul.f32 -1.442695, %v1010_v19  ;;  %v1004_v24 = vpop.f32.mrb[11].mxu0 }
 0x33a   : > { %v1427_v43 = vmul.f32 -1.442695, %v1724_v21  ;;  %v1725_v25 = vadd.high.f32.bf16 %v1004_v24, %v1649_v16 }
 0x33b   : > { %1708 = vpow2.f32 %v1429_v23 }
 0x33c   : > { %1710 = vpow2.f32 %v1427_v43  ;;  %v1428_v26 = vmul.f32 -1.442695, %v1725_v25 }
 0x33e   : > { %1712 = vpow2.f32 %v1428_v26 }
 0x345   : > { %v1709_v27 = vpop.eup %1708 }
 0x346   : > { %v1711_v28 = vpop.eup %1710  ;;  %v1026_v39 = vadd.f32 1.0, %v1709_v27 }
 0x347   : > { %v1024_v29 = vadd.f32 1.0, %v1711_v28 }
 0x348   : > { %v1713_v30 = vpop.eup %1712  ;;  %1714 = vrcp.f32 %v1026_v39 }
 0x349   : > { %v1025_v31 = vadd.f32 1.0, %v1713_v30  ;;  %1716 = vrcp.f32 %v1024_v29 }
 0x34b   : > { %1718 = vrcp.f32 %v1025_v31 }
 0x352   : > { %v1715_v32 = vpop.eup %1714 }
 0x353   : > { %v1717_v33 = vpop.eup %1716  ;;  %v1037_v36 = vpack.c.bf16 %v1715_v32, %v1715_v32 }
 0x355   : > { %v1719_v34 = vpop.eup %1718 }
 0x356   : > { %v1036_v35 = vpack.c.bf16 %v1719_v34, %v1717_v33 }
 0x358   : > { %1528 = vmatprep.mubr.bf16.mxu0 %v1036_v35 }
 0x359   : > { %1529 = vmatmul.mubr.bf16.vlgmr.msra.gmra.mrb[12].mxu0 %v1037_v36 }
 0x42c   : > { %v1530_v42 = vpop.f32.mrb[12].mxu0 }
 0x42d   : > { %v1152_v45 = vadd.f32 %v1530_v42, %v1035_v41  ;;  %v1136_v46 = vpop.f32.mrb[13].mxu0 }
 0x42e   : > { %v1531_v47 = vpop.f32.mrb[14].mxu0 }
 0x42f   : > { %1155 = vst [vmem:[#allocation3 + $0x10] sm:$0x3f] %v1152_v45  ;;  %v1139_v48 = vpop.f32.mrb[15].mxu0 }
 0x430   : > { %v1163_v49 = vpack.c.bf16 %v1139_v48, %v1136_v46 }
 0x432   : > { %1533 = vmatpush3.bf16.msra.mxu1 %v1163_v49 }
 0x433   : > { %1534 = vmatprep.subr.bf16.mxu1 %v1915_v15 }
 0x436   : > { %v1162_v50 = vld [vmem:[#allocation3 + $0x10] sm:$0x3f] }
 0x437   : > { %v1164_v51 = vpack.c.bf16 %v1162_v50, %v1162_v50 }
 0x439   : > { %v1184_v52 = vsel %vm1182_vm0, %v1164_v51, 0 }
 0x43a   : > { %1535 = vmatpush3.bf16.msra.mxu1 %v1184_v52 }
 0x43d   : > { %1537 = vmatmul.mubr.msk.bf16.vlgmr.msra.gmra.mrb[8].mxu1 %vm1178_vm1, %v1159_v37 }
 0x510   : > { %v1220_v59 = vpop.f32.mrb[8].mxu1 }
 0x511   : > { %v1221_v60 = vadd.f32 %v1220_v59, %v1177_v58  ;;  %v1538_v61 = vpop.f32.mrb[9].mxu1 }
 0x512   : > { %v1223_v62 = vpop.f32.mrb[10].mxu1 }
 0x513   : > { %v1439_v63 = vmul.f32 -1.442695, %v1221_v60  ;;  %v1539_v0 = vpop.f32.mrb[11].mxu1 }
 0x515   : > { %1720 = vpow2.f32 %v1439_v63 }
 0x51f   : > { %v1721_v1 = vpop.eup %1720 }
 0x520   : > { %v1229_v2 = vadd.f32 1.0, %v1721_v1 }
 0x522   : > { %1722 = vrcp.f32 %v1229_v2 }
 0x52c   : > { %v1723_v14 = vpop.eup %1722 }
 0x52d   : > { %1232 = vst [vmem:[%s434_s19] sm:$0xf] %v1723_v14 }
 0x52e   : > { %1825 = shalt.err (!%p1822_p0)
}
 0x52f   : > { %s1826_s28 = scalar_lea.hbm %s2285_s24, 64  ;;  %s1830_s30 = scalar_lea.hbm %s2366_s18, 128 }
 0x530   : > { %p1827_p4 = scmp.ne.s32.totalorder %s2285_s24, %s1826_s28  ;;  %p1831_p7 = scmp.lt.u32.totalorder %s2285_s24, %s2366_s18 }
 0x531   : > { %p1832_p2 = scmp.lt.u32.totalorder %s1830_s30, %s1826_s28  ;;  %p1834_p12 = scmp.lt.u32.totalorder %s1826_s28, %s2285_s24 }
 0x532   : > { %p1828_p13 = pnand %p1827_p4, %p2367_p1 }
 0x533   : > { %p1833_p8 = por %p1832_p2, %p1831_p7 }
 0x534   : > { %p1829_p6 = pneg %p1828_p13 }
 0x535   : > { %p1835_p10 = por %p1834_p12, %p1833_p8 }
 0x537   : > { %p1836_p3 = pnand %p1835_p10, %p1829_p6 }
 0x539   : > { %1839 = shalt.err (!%p1836_p3)
}
 0x53a   : > { %1555 = dma.vmem_to_hbm [thread:$0]  (%p2367_p1), %s2287_s15, 64, %s2285_s24, %s1234_s26  }
 0x53b PF: > { %s2368_s17 = sld [smem:[#allocation14_spill]]  ;;  %s2369_s23 = sld [smem:[#allocation15_spill]] }
 0x53c   : > { %p2371_p9 = scmp.ge.s32.totalorder %s1898_s14, 2 }
 0x541   : > { %s1259_s16 = sand.u32 1, %s2368_s17   ;;  %p2370_p5 = scmp.ne.s32.totalorder %s2369_s23, 0 }
 0x542   : > { %s1260_s12 = scalar_lea.sflag [#allocation6], %s1259_s16 }
 0x543   : > { %p1569_p11 = pnand %p2371_p9, %p2370_p5 }
 0x545   : > { %1873 = dma.done.wait (!%p1569_p11), %s1260_s12, 64  }
 0x546   : > { %1875 = vsyncadd (!%p1569_p11), %s1260_s12, 4294967232  ;;  %s26_s14 = sadd.s32 1, %s1898_s14   ;;  %s2372_s30 = smov %s1882_s10 }
 0x547   : > { %p23_p0 = scmp.ge.s32.totalorder %s26_s14, 4   ;;  %s2373_s10 = smov %s1886_s11 }
 0x548   : > { %s2374_s11 = smov %s2112_s22  ;;  %s2375_s12 = smov %s1894_s13 }
 0x549   : > { %s2376_s13 = smov %s2378_s27  ;;  %25 = sbr.rel (!%p23_p0) target bundleno = 10 (0xa), region = 125 }
 0x550   :  { %1265 = vsyncpa [#allocation5], 1 }
 0x551   :  { %1267 = vsyncpa [#allocation5 + $0x1], 1 }
 0x552   :  { %1268 = vsyncpa [#allocation8], 1 }
 0x553   :  { %1269 = vsyncpa [#allocation6], 1 }
 0x554   :  { %1271 = vsyncpa [#allocation6 + $0x1], 1 }

</bundles_post_ra>
